<compile_context>
chip_gen: v7x
topology: tpu7x:2x2x1
jax: 0.10.0
libtpu: 0.0.40
codegen_flags: <defaults>
</compile_context>

<pallas_src>
import functools

import jax
import jax.numpy as jnp
from jax.experimental import pallas as pl
from jax.experimental.pallas import tpu as pltpu


def _ensemble_fused_kernel(x_ref, w1_ref, b1_ref, w2_ref, b2_ref, o_ref, *, inv_m):
    # x:  (TB, D)   bf16      w1: (D, Hp)   bf16     b1: (1, Hp)  f32
    # w2: (Hp, Kp)  bf16      b2: (1, Kp)   f32      o:  (TB, Kp) f32
    h = jnp.dot(x_ref[...], w1_ref[...], preferred_element_type=jnp.float32)
    h = jnp.maximum(h + b1_ref[...], 0.0)                       # f32 epilogue (VPU)
    y = jnp.dot(h.astype(w2_ref.dtype), w2_ref[...],
                preferred_element_type=jnp.float32)             # contraction sums models
    o_ref[...] = y * inv_m + b2_ref[...]                        # mean over models


def _round_up(n, m):
    return ((n + m - 1) // m) * m


def ensemble_forward(x_nchw, w1, b1, w2, b2):
    """x_nchw: (B,C,H,W); w1: (M,D,Hd); b1: (M,Hd); w2: (M,Hd,K); b2: (M,K)."""
    B = x_nchw.shape[0]
    M, D, Hd = w1.shape
    K = w2.shape[-1]

    # Batch tiling: sublane-aligned; large batches get 256-row tiles that are
    # pipelined over a "parallel" grid axis (megacore-shardable on v7x).
    TB = 256 if B >= 256 else _round_up(max(B, 8), 8)
    Bp = _round_up(max(B, 8), TB)
    nb = Bp // TB

    Hcat = M * Hd                       # fused hidden dim (all models)
    Hp = _round_up(Hcat, 128)           # lane-dense fused hidden dim
    Kp = _round_up(K, 128)              # lane-dense output dim

    # --- wrapper-side layout plumbing (pure reshape / pad / cast) -------------
    xf = x_nchw.reshape(B, D).astype(jnp.float32)
    x_p = jnp.zeros((Bp, D), jnp.float32).at[:B].set(xf).astype(jnp.bfloat16)

    w1cat = jnp.transpose(w1, (1, 0, 2)).reshape(D, Hcat)               # (D, M*Hd)
    w1_p = jnp.zeros((D, Hp), jnp.float32).at[:, :Hcat].set(w1cat).astype(jnp.bfloat16)
    b1_p = jnp.zeros((1, Hp), jnp.float32).at[0, :Hcat].set(b1.reshape(Hcat))

    w2cat = w2.reshape(Hcat, K)                                         # (M*Hd, K)
    w2_p = jnp.zeros((Hp, Kp), jnp.float32).at[:Hcat, :K].set(w2cat).astype(jnp.bfloat16)
    b2_p = jnp.zeros((1, Kp), jnp.float32).at[0, :K].set(jnp.mean(b2, axis=0))

    kernel = functools.partial(_ensemble_fused_kernel, inv_m=1.0 / M)

    out_p = pl.pallas_call(
        kernel,
        out_shape=jax.ShapeDtypeStruct((Bp, Kp), jnp.float32),
        grid_spec=pltpu.PrefetchScalarGridSpec(
            num_scalar_prefetch=0,
            grid=(nb,),                                    # batch tiles
            in_specs=[
                pl.BlockSpec((TB, D), lambda i: (i, 0)),   # x tile (bf16, pipelined)
                pl.BlockSpec((D, Hp), lambda i: (0, 0)),   # W1cat (bf16, resident)
                pl.BlockSpec((1, Hp), lambda i: (0, 0)),   # b1cat (f32, resident)
                pl.BlockSpec((Hp, Kp), lambda i: (0, 0)),  # W2cat (bf16, resident)
                pl.BlockSpec((1, Kp), lambda i: (0, 0)),   # mean(b2) (f32, resident)
            ],
            out_specs=pl.BlockSpec((TB, Kp), lambda i: (i, 0)),
        ),
        compiler_params=pltpu.CompilerParams(
            dimension_semantics=("parallel",),
        ),
    )(x_p, w1_p, b1_p, w2_p, b2_p)

    return out_p[:B, :K]


def _reference(x_nchw, w1, b1, w2, b2):
    B = x_nchw.shape[0]
    M, D, Hd = w1.shape
    xf = x_nchw.reshape(B, D).astype(jnp.float32)
    preds = []
    for m in range(M):
        h = jnp.maximum(xf @ w1[m] + b1[m], 0.0)
        preds.append(h @ w2[m] + b2[m])
    return jnp.mean(jnp.stack(preds), axis=0)


if __name__ == "__main__":
    key = jax.random.PRNGKey(0)
    kx, kw1, kb1, kw2, kb2 = jax.random.split(key, 5)

    # Small shapes consistent with the forward pass.
    B, C, Himg, Wimg = 2, 4, 16, 16
    D = C * Himg * Wimg          # 1024
    HID = 32
    NUM_CLASSES = 8
    NUM_MODELS = 3

    x = jax.random.normal(kx, (B, C, Himg, Wimg), dtype=jnp.float32)
    # Deterministic synthetic parameters for each sub-model.
    w1 = jax.random.normal(kw1, (NUM_MODELS, D, HID), dtype=jnp.float32) * 0.05
    b1 = jax.random.normal(kb1, (NUM_MODELS, HID), dtype=jnp.float32) * 0.05
    w2 = jax.random.normal(kw2, (NUM_MODELS, HID, NUM_CLASSES), dtype=jnp.float32) * 0.05
    b2 = jax.random.normal(kb2, (NUM_MODELS, NUM_CLASSES), dtype=jnp.float32) * 0.05

    out = jax.block_until_ready(ensemble_forward(x, w1, b1, w2, b2))

    ref = _reference(x, w1, b1, w2, b2)
    assert out.shape == (B, NUM_CLASSES)
    # Tolerance widened for bf16 MXU inputs (f32 accumulation / epilogue kept).
    assert jnp.allclose(out, ref, atol=5e-2, rtol=5e-2), "mismatch vs reference"

    print("KERNEL_OK")
</pallas_src>

<mosaic_0001>
module attributes {stable_mosaic.version = 11 : i64} {
  func.func @_ensemble_fused_kernel(%arg0: i32, %arg1: memref<8x1024xbf16, #tpu.memory_space<vmem>>, %arg2: memref<1024x128xbf16, #tpu.memory_space<vmem>>, %arg3: memref<1x128xf32, #tpu.memory_space<vmem>>, %arg4: memref<128x128xbf16, #tpu.memory_space<vmem>>, %arg5: memref<1x128xf32, #tpu.memory_space<vmem>>, %arg6: memref<8x128xf32, #tpu.memory_space<vmem>>) attributes {dimension_semantics = [#tpu.dimension_semantics<parallel>], iteration_bounds = array<i64: 1>, scalar_prefetch = 0 : i64, scratch_operands = 0 : i64, tpu.core_type = #tpu.core_type<tc>, window_params = [{transform_indices = @transform_0, window_bounds = array<i64: 8, 1024>}, {pipeline_mode = #tpu.pipeline_mode<synchronous>, transform_indices = @transform_1, window_bounds = array<i64: 1024, 128>}, {pipeline_mode = #tpu.pipeline_mode<synchronous>, transform_indices = @transform_2, window_bounds = array<i64: 1, 128>}, {pipeline_mode = #tpu.pipeline_mode<synchronous>, transform_indices = @transform_3, window_bounds = array<i64: 128, 128>}, {pipeline_mode = #tpu.pipeline_mode<synchronous>, transform_indices = @transform_4, window_bounds = array<i64: 1, 128>}, {transform_indices = @transform_5, window_bounds = array<i64: 8, 128>}]} {
    %c0 = arith.constant 0 : index
    %c0_0 = arith.constant 0 : index
    %0 = vector.load %arg1[%c0, %c0_0] : memref<8x1024xbf16, #tpu.memory_space<vmem>>, vector<8x1024xbf16>
    %c0_1 = arith.constant 0 : index
    %c0_2 = arith.constant 0 : index
    %1 = vector.load %arg2[%c0_1, %c0_2] : memref<1024x128xbf16, #tpu.memory_space<vmem>>, vector<1024x128xbf16>
    %cst = arith.constant dense<0.000000e+00> : vector<8x128xf32>
    %2 = tpu.matmul %0, %1, %cst {dimension_numbers = #tpu.dot_dimension_numbers<[1], [0], [0], [1], [0, 0, 1, 1], [], []>} : vector<8x1024xbf16>, vector<1024x128xbf16>, vector<8x128xf32> -> vector<8x128xf32>
    %c0_3 = arith.constant 0 : index
    %c0_4 = arith.constant 0 : index
    %3 = vector.load %arg3[%c0_3, %c0_4] : memref<1x128xf32, #tpu.memory_space<vmem>>, vector<1x128xf32>
    %4 = vector.broadcast %3 : vector<1x128xf32> to vector<8x128xf32>
    %5 = arith.addf %2, %4 : vector<8x128xf32>
    %cst_5 = arith.constant 0.000000e+00 : f32
    %6 = vector.broadcast %cst_5 : f32 to vector<8x128xf32>
    %7 = arith.maximumf %5, %6 : vector<8x128xf32>
    %8 = arith.truncf %7 : vector<8x128xf32> to vector<8x128xbf16>
    %c0_6 = arith.constant 0 : index
    %c0_7 = arith.constant 0 : index
    %9 = vector.load %arg4[%c0_6, %c0_7] : memref<128x128xbf16, #tpu.memory_space<vmem>>, vector<128x128xbf16>
    %cst_8 = arith.constant dense<0.000000e+00> : vector<8x128xf32>
    %10 = tpu.matmul %8, %9, %cst_8 {dimension_numbers = #tpu.dot_dimension_numbers<[1], [0], [0], [1], [0, 0, 1, 1], [], []>} : vector<8x128xbf16>, vector<128x128xbf16>, vector<8x128xf32> -> vector<8x128xf32>
    %cst_9 = arith.constant 0.333333343 : f32
    %11 = vector.broadcast %cst_9 : f32 to vector<8x128xf32>
    %12 = arith.mulf %10, %11 : vector<8x128xf32>
    %c0_10 = arith.constant 0 : index
    %c0_11 = arith.constant 0 : index
    %13 = vector.load %arg5[%c0_10, %c0_11] : memref<1x128xf32, #tpu.memory_space<vmem>>, vector<1x128xf32>
    %14 = vector.broadcast %13 : vector<1x128xf32> to vector<8x128xf32>
    %15 = arith.addf %12, %14 : vector<8x128xf32>
    %c0_12 = arith.constant 0 : index
    %c0_13 = arith.constant 0 : index
    %16 = vector.load %arg6[%c0_12, %c0_13] : memref<8x128xf32, #tpu.memory_space<vmem>>, vector<8x128xf32>
    tpu.vector_store %arg6[%c0_12, %c0_13], %15 {strides = array<i32>} : memref<8x128xf32, #tpu.memory_space<vmem>>, vector<8x128xf32>,
    return
  }
  func.func @transform_0(%arg0: i32) -> (i32, i32) {
    %c0_i32 = arith.constant 0 : i32
    %c0_i32_0 = arith.constant 0 : i32
    return %arg0, %c0_i32 : i32, i32
  }
  func.func @transform_1(%arg0: i32) -> (i32, i32) {
    %c0_i32 = arith.constant 0 : i32
    %c0_i32_0 = arith.constant 0 : i32
    %c0_i32_1 = arith.constant 0 : i32
    return %c0_i32, %c0_i32_0 : i32, i32
  }
  func.func @transform_2(%arg0: i32) -> (i32, i32) {
    %c0_i32 = arith.constant 0 : i32
    %c0_i32_0 = arith.constant 0 : i32
    %c0_i32_1 = arith.constant 0 : i32
    return %c0_i32, %c0_i32_0 : i32, i32
  }
  func.func @transform_3(%arg0: i32) -> (i32, i32) {
    %c0_i32 = arith.constant 0 : i32
    %c0_i32_0 = arith.constant 0 : i32
    %c0_i32_1 = arith.constant 0 : i32
    return %c0_i32, %c0_i32_0 : i32, i32
  }
  func.func @transform_4(%arg0: i32) -> (i32, i32) {
    %c0_i32 = arith.constant 0 : i32
    %c0_i32_0 = arith.constant 0 : i32
    %c0_i32_1 = arith.constant 0 : i32
    return %c0_i32, %c0_i32_0 : i32, i32
  }
  func.func @transform_5(%arg0: i32) -> (i32, i32) {
    %c0_i32 = arith.constant 0 : i32
    %c0_i32_0 = arith.constant 0 : i32
    return %arg0, %c0_i32 : i32, i32
  }
}

</mosaic_0001>

<bundles_post_ra>
// kernel: tpu_custom_call.1
= control target key start
LH: loop header
LB: loop body
LE: loop exit
PB: predicated region body
PF: predicated region fallthrough
CT: control target
= control target key end

     0   :  { %10 = vsyncpa [#allocation3], 0  ;;  %s1383_s0 = inlined_call_operand.hbm [shape: bf16[8,1024], index: 0, kind: input, shape index: {}]   ;;  %s1384_s1 = inlined_call_operand.hbm [shape: bf16[1024,128], index: 1, kind: input, shape index: {}]   ;;  %s1385_s2 = inlined_call_operand.vmem [shape: f32[1,128], index: 2, kind: input, shape index: {}]   ;;  %s1386_s3 = inlined_call_operand.hbm [shape: bf16[128,128], index: 3, kind: input, shape index: {}]   ;;  %s1387_s4 = inlined_call_operand.vmem [shape: f32[1,128], index: 4, kind: input, shape index: {}]   ;;  %s1388_s5 = inlined_call_operand.hbm [shape: f32[8,128], index: 5, kind: output, shape index: {}]  }
   0x1   :  { %11 = vsyncpa [#allocation6], 0 }
   0x2   :  { %12 = vsyncpa [#allocation4], 0  ;;  %s1285_s18 = smov [#allocation5]   ;;  %s1191_s22 = scalar_lea.hbm %s1384_s1, 8192 }
   0x3   :  { %s28_s19 = sshll.u32 %s1285_s18, 4  ;;  %p1192_p0 = scmp.ne.s32.totalorder %s1384_s1, %s1191_s22  ;;  %s29_s19 = int_to_ptr.vmem [resolvable:$true] %s28_s19 }
   0x4   :  { %p1195_p1 = scmp.lt.u32.totalorder %s1191_s22, %s1384_s1 }
   0x6   :  { %p1197_p2 = pnand %p1195_p1, %p1192_p0 }
   0x8   :  { %1200 = shalt.err (!%p1197_p2)
}
   0x9   :  { %s1201_s27 = scalar_lea.vmem %s29_s19, 8192  ;;  %p1206_p4 = scmp.lt.s32.totalorder %s29_s19, %s29_s19 }
   0xa   :  { %p1202_p3 = scmp.ne.s32.totalorder %s29_s19, %s1201_s27  ;;  %p1207_p5 = scmp.lt.s32.totalorder %s1201_s27, %s1201_s27 }
   0xc   :  { %p1208_p6 = por %p1207_p5, %p1206_p4 }
   0xe   :  { %p1209_p7 = pnand %p1208_p6, %p1202_p3 }
  0x10   :  { %1212 = shalt.err (!%p1209_p7)
}
  0x11   :  { %s1286_s28 = smov 64   ;;  %s1287_s29 = smov 4  }
  0x12   :  { %34 = dma.hbm_to_vmem [thread:$0]  %s1384_s1, 8192, %s29_s19, [#allocation6], %s1286_s28, %s1286_s28, %s1287_s29  }
  0x13   :  { %s1288_s7 = smov [#allocation2]   ;;  %s1289_s9 = smov [#allocation7]  }
  0x14   :  { %s19_s8 = sshll.u32 %s1288_s7, 4  ;;  %s42_s10 = sshll.u32 %s1289_s9, 4  ;;  %s20_s8 = int_to_ptr.vmem [resolvable:$true] %s19_s8  ;;  %s43_s10 = int_to_ptr.vmem [resolvable:$true] %s42_s10 }
  0x15   :  { %s1213_s13 = scalar_lea.hbm %s1383_s0, 512 }
  0x16   :  { %p1214_p8 = scmp.ne.s32.totalorder %s1383_s0, %s1213_s13  ;;  %p1217_p9 = scmp.lt.u32.totalorder %s1213_s13, %s1383_s0 }
  0x18   :  { %p1219_p10 = pnand %p1217_p9, %p1214_p8 }
  0x1a   :  { %1222 = shalt.err (!%p1219_p10)
}
  0x1b   :  { %s1223_s1 = scalar_lea.vmem %s20_s8, 512  ;;  %p1228_p12 = scmp.lt.s32.totalorder %s20_s8, %s20_s8 }
  0x1c   :  { %p1224_p11 = scmp.ne.s32.totalorder %s20_s8, %s1223_s1  ;;  %p1229_p13 = scmp.lt.s32.totalorder %s1223_s1, %s1223_s1 }
  0x1e   :  { %p1230_p0 = por %p1229_p13, %p1228_p12 }
  0x20   :  { %p1231_p1 = pnand %p1230_p0, %p1224_p11 }
  0x22   :  { %1234 = shalt.err (!%p1231_p1)
}
  0x23   :  { %22 = dma.hbm_to_vmem [thread:$0]  %s1383_s0, 512, %s20_s8, [#allocation3]  }
  0x24   :  { %s1235_s22 = scalar_lea.hbm %s1386_s3, 1024 }
  0x25   :  { %p1236_p2 = scmp.ne.s32.totalorder %s1386_s3, %s1235_s22  ;;  %p1239_p3 = scmp.lt.u32.totalorder %s1235_s22, %s1386_s3 }
  0x27   :  { %p1241_p4 = pnand %p1239_p3, %p1236_p2 }
  0x29   :  { %1244 = shalt.err (!%p1241_p4)
}
  0x2a   :  { %s1245_s27 = scalar_lea.vmem %s43_s10, 1024  ;;  %p1250_p6 = scmp.lt.s32.totalorder %s43_s10, %s43_s10 }
  0x2b   :  { %p1246_p5 = scmp.ne.s32.totalorder %s43_s10, %s1245_s27  ;;  %p1251_p7 = scmp.lt.s32.totalorder %s1245_s27, %s1245_s27 }
  0x2d   :  { %p1252_p8 = por %p1251_p7, %p1250_p6 }
  0x2f   :  { %p1253_p9 = pnand %p1252_p8, %p1246_p5 }
  0x31   :  { %1256 = shalt.err (!%p1253_p9)
}
  0x32   :  { %48 = dma.hbm_to_vmem [thread:$0]  %s1386_s3, 1024, %s43_s10, [#allocation6], %s1286_s28, %s1286_s28, %s1287_s29  }
  0x33   :  { %1279 = dma.done.wait [#allocation3], 512  }
  0x34   :  { %1280 = vsyncadd [#allocation3], 4294966784 }
  0x35   :  { %1281 = dma.done.wait [#allocation6], 9216  }
  0x36   :  { %1282 = vsyncadd [#allocation6], 4294958080  ;;  %v1111_v0 = vld [vmem:[#allocation5 + $0x40] sm:$0xff]   ;;  %v1115_v4 = vld [vmem:[#allocation5 + $0x48] sm:$0xff]   ;;  %vm1291_vm0 = vmmov 0   ;;  %s1292_s6 = smov [#allocation8]  }
  0x37   :  { %v1112_v1 = vld [vmem:[#allocation5 + $0xc0] sm:$0xff]   ;;  %986 = vmatprep.subr.bf16.mxu0 %v1111_v0  ;;  %v1116_v5 = vld [vmem:[#allocation5 + $0xc8] sm:$0xff]   ;;  %v1119_v8 = vld [vmem:[#allocation5 + $0x50] sm:$0xff]   ;;  %s894_s7 = sshll.u32 %s1292_s6, 4  ;;  %s895_s7 = int_to_ptr.vmem [resolvable:$true] %s894_s7 }
  0x38   :  { %v1113_v2 = vld [vmem:[#allocation5] sm:$0xff]   ;;  %1008 = vmatprep.subr.bf16.mxu1 %v1112_v1  ;;  %v1117_v6 = vld [vmem:[#allocation5 + $0x8] sm:$0xff]   ;;  %v1120_v9 = vld [vmem:[#allocation5 + $0xd0] sm:$0xff]   ;;  %s1257_s8 = scalar_lea.vmem %s895_s7, 128  ;;  %p1262_p11 = scmp.lt.s32.totalorder %s895_s7, %s895_s7 }
  0x39   :  { %v1114_v3 = vld [vmem:[#allocation5 + $0x80] sm:$0xff]   ;;  %987 = vmatpush3.bf16.msra.mxu0 %v1113_v2  ;;  %v1118_v7 = vld [vmem:[#allocation5 + $0x88] sm:$0xff]   ;;  %v1121_v10 = vld [vmem:[#allocation5 + $0x10] sm:$0xff]   ;;  %p1258_p10 = scmp.ne.s32.totalorder %s895_s7, %s1257_s8  ;;  %p1263_p12 = scmp.lt.s32.totalorder %s1257_s8, %s1257_s8 }
  0x3a   :  { %1009 = vmatpush3.bf16.msra.mxu1 %v1114_v3  ;;  %988 = vmatprep.subr.bf16.mxu0 %v1115_v4  ;;  %v1122_v11 = vld [vmem:[#allocation5 + $0x90] sm:$0xff]   ;;  %v1123_v12 = vld [vmem:[#allocation5 + $0x58] sm:$0xff]   ;;  %v1127_v16 = vld [vmem:[#allocation5 + $0x60] sm:$0xff]  }
  0x3b   :  { %1010 = vmatprep.subr.bf16.mxu1 %v1116_v5  ;;  %v1124_v13 = vld [vmem:[#allocation5 + $0xd8] sm:$0xff]   ;;  %v1128_v17 = vld [vmem:[#allocation5 + $0xe0] sm:$0xff]   ;;  %v1131_v20 = vld [vmem:[#allocation5 + $0x68] sm:$0xff]   ;;  %p1264_p13 = por %p1263_p12, %p1262_p11 }
  0x3c   :  { %v1125_v14 = vld [vmem:[#allocation5 + $0x18] sm:$0xff]   ;;  %v1129_v18 = vld [vmem:[#allocation5 + $0x20] sm:$0xff]   ;;  %v1132_v21 = vld [vmem:[#allocation5 + $0xe8] sm:$0xff]  }
  0x3d   :  { %989 = vmatpush3.bf16.msra.mxu0 %v1117_v6  ;;  %v1126_v15 = vld [vmem:[#allocation5 + $0x98] sm:$0xff]   ;;  %v1130_v19 = vld [vmem:[#allocation5 + $0xa0] sm:$0xff]   ;;  %v1133_v22 = vld [vmem:[#allocation5 + $0x28] sm:$0xff]   ;;  %p1265_p0 = pnand %p1264_p13, %p1258_p10 }
  0x3e   :  { %1011 = vmatpush3.bf16.msra.mxu1 %v1118_v7  ;;  %990 = vmatprep.subr.bf16.mxu0 %v1119_v8  ;;  %v1134_v23 = vld [vmem:[#allocation5 + $0xa8] sm:$0xff]   ;;  %v1135_v24 = vld [vmem:[#allocation5 + $0x70] sm:$0xff]   ;;  %v1139_v28 = vld [vmem:[#allocation5 + $0x78] sm:$0xff]  }
  0x3f   :  { %1012 = vmatprep.subr.bf16.mxu1 %v1120_v9  ;;  %v1136_v25 = vld [vmem:[#allocation5 + $0xf0] sm:$0xff]   ;;  %v1140_v29 = vld [vmem:[#allocation5 + $0xf8] sm:$0xff]   ;;  %v61_v32 = vld [vmem:[#allocation2] sm:$0xff] }
  0x40   :  { %v1137_v26 = vld [vmem:[#allocation5 + $0x30] sm:$0xff]   ;;  %v1141_v30 = vld [vmem:[#allocation5 + $0x38] sm:$0xff]   ;;  %v62_v33 = vld [vmem:[#allocation2 + $0x8] sm:$0xff]  ;;  %v905_v34 = vcombine.low %v61_v32, %v61_v32  ;;  %v906_v35 = vcombine.high %v61_v32, %v61_v32 }
  0x41   :  { %991 = vmatpush3.bf16.msra.mxu0 %v1121_v10  ;;  %v1138_v27 = vld [vmem:[#allocation5 + $0xb0] sm:$0xff]   ;;  %v1142_v31 = vld [vmem:[#allocation5 + $0xb8] sm:$0xff]   ;;  %v907_v36 = vcombine.low %v62_v33, %v62_v33  ;;  %v908_v37 = vcombine.high %v62_v33, %v62_v33  ;;  %v1147_v38 = vld [vmem:[#allocation5 + $0x140] sm:$0xff]  }
  0x42   :  { %1013 = vmatpush3.bf16.msra.mxu1 %v1122_v11  ;;  %992 = vmatprep.subr.bf16.mxu0 %v1123_v12  ;;  %v1148_v39 = vld [vmem:[#allocation5 + $0x1c0] sm:$0xff]   ;;  %v1151_v42 = vld [vmem:[#allocation5 + $0x148] sm:$0xff]   ;;  %v1155_v46 = vld [vmem:[#allocation5 + $0x150] sm:$0xff]  }
  0x43   :  { %1014 = vmatprep.subr.bf16.mxu1 %v1124_v13  ;;  %644 = vmatprep.mubr.bf16.mxu0 %v906_v35  ;;  %v1149_v40 = vld [vmem:[#allocation5 + $0x100] sm:$0xff]   ;;  %v1152_v43 = vld [vmem:[#allocation5 + $0x1c8] sm:$0xff]   ;;  %v1156_v47 = vld [vmem:[#allocation5 + $0x1d0] sm:$0xff]   ;;  %v1290_v13 = vmov 0.0  }
  0x44   :  { %684 = vmatprep.mubr.bf16.mxu1 %v908_v37  ;;  %v1150_v41 = vld [vmem:[#allocation5 + $0x180] sm:$0xff]   ;;  %v1153_v44 = vld [vmem:[#allocation5 + $0x108] sm:$0xff]   ;;  %v1157_v48 = vld [vmem:[#allocation5 + $0x110] sm:$0xff]  }
  0x45   :  { %993 = vmatpush3.bf16.msra.mxu0 %v1125_v14  ;;  %v1154_v45 = vld [vmem:[#allocation5 + $0x188] sm:$0xff]   ;;  %v1158_v49 = vld [vmem:[#allocation5 + $0x190] sm:$0xff]   ;;  %v1159_v50 = vld [vmem:[#allocation5 + $0x158] sm:$0xff]  }
  0x46   :  { %1015 = vmatpush3.bf16.msra.mxu1 %v1126_v15  ;;  %994 = vmatprep.subr.bf16.mxu0 %v1127_v16  ;;  %v1160_v51 = vld [vmem:[#allocation5 + $0x1d8] sm:$0xff]   ;;  %v1163_v54 = vld [vmem:[#allocation5 + $0x160] sm:$0xff]   ;;  %v1167_v58 = vld [vmem:[#allocation5 + $0x168] sm:$0xff]  }
  0x47   :  { %1016 = vmatprep.subr.bf16.mxu1 %v1128_v17  ;;  %v1161_v52 = vld [vmem:[#allocation5 + $0x118] sm:$0xff]   ;;  %v1164_v55 = vld [vmem:[#allocation5 + $0x1e0] sm:$0xff]   ;;  %v1168_v59 = vld [vmem:[#allocation5 + $0x1e8] sm:$0xff]  }
  0x48   :  { %v1162_v53 = vld [vmem:[#allocation5 + $0x198] sm:$0xff]   ;;  %v1165_v56 = vld [vmem:[#allocation5 + $0x120] sm:$0xff]   ;;  %v1169_v60 = vld [vmem:[#allocation5 + $0x128] sm:$0xff]  }
  0x49   :  { %995 = vmatpush3.bf16.msra.mxu0 %v1129_v18  ;;  %v1166_v57 = vld [vmem:[#allocation5 + $0x1a0] sm:$0xff]   ;;  %v1170_v61 = vld [vmem:[#allocation5 + $0x1a8] sm:$0xff]   ;;  %v1171_v62 = vld [vmem:[#allocation5 + $0x170] sm:$0xff]  }
  0x4a   :  { %1017 = vmatpush3.bf16.msra.mxu1 %v1130_v19  ;;  %996 = vmatprep.subr.bf16.mxu0 %v1131_v20  ;;  %v1172_v63 = vld [vmem:[#allocation5 + $0x1f0] sm:$0xff]   ;;  %v1175_v2 = vld [vmem:[#allocation5 + $0x178] sm:$0xff]   ;;  %v1183_v12 = vld [vmem:[#allocation7] sm:$0xff]  }
  0x4b   :  { %1018 = vmatprep.subr.bf16.mxu1 %v1132_v21  ;;  %v1173_v0 = vld [vmem:[#allocation5 + $0x130] sm:$0xff]   ;;  %v1176_v3 = vld [vmem:[#allocation5 + $0x1f8] sm:$0xff]   ;;  %v1184_v14 = vld [vmem:[#allocation7 + $0x8] sm:$0xff]  }
  0x4c   :  { %v1174_v1 = vld [vmem:[#allocation5 + $0x1b0] sm:$0xff]   ;;  %v1177_v4 = vld [vmem:[#allocation5 + $0x138] sm:$0xff]   ;;  %v1187_v17 = vld [vmem:[#allocation7 + $0x20] sm:$0xff]  }
  0x4d   :  { %997 = vmatpush3.bf16.msra.mxu0 %v1133_v22  ;;  %v1178_v5 = vld [vmem:[#allocation5 + $0x1b8] sm:$0xff]   ;;  %v63_v6 = vld [vmem:[#allocation2 + $0x10] sm:$0xff]  ;;  %v1188_v18 = vld [vmem:[#allocation7 + $0x28] sm:$0xff]  }
  0x4e   :  { %1019 = vmatpush3.bf16.msra.mxu1 %v1134_v23  ;;  %998 = vmatprep.subr.bf16.mxu0 %v1135_v24  ;;  %v909_v7 = vcombine.low %v63_v6, %v63_v6  ;;  %v910_v8 = vcombine.high %v63_v6, %v63_v6  ;;  %v64_v9 = vld [vmem:[#allocation2 + $0x18] sm:$0xff]  ;;  %v1185_v15 = vld [vmem:[#allocation7 + $0x10] sm:$0xff]   ;;  %v904_v23 = vld [vmem:[%s1385_s2] ss:$0 sm:$0xff] }
  0x4f   :  { %1020 = vmatprep.subr.bf16.mxu1 %v1136_v25  ;;  %v911_v10 = vcombine.low %v64_v9, %v64_v9  ;;  %v912_v11 = vcombine.high %v64_v9, %v64_v9  ;;  %v1186_v16 = vld [vmem:[#allocation7 + $0x18] sm:$0xff]   ;;  %v1189_v19 = vld [vmem:[#allocation7 + $0x30] sm:$0xff]  }
  0x50   :  { %v1190_v20 = vld [vmem:[#allocation7 + $0x38] sm:$0xff]  }
  0x51   :  { %999 = vmatpush3.bf16.msra.mxu0 %v1137_v26 }
  0x52   :  { %1021 = vmatpush3.bf16.msra.mxu1 %v1138_v27  ;;  %1000 = vmatprep.subr.bf16.mxu0 %v1139_v28 }
  0x53   :  { %1022 = vmatprep.subr.bf16.mxu1 %v1140_v29 }
  0x55   :  { %1001 = vmatpush3.bf16.msra.mxu0 %v1141_v30 }
  0x56   :  { %1023 = vmatpush3.bf16.msra.mxu1 %v1142_v31  ;;  %1030 = vmatprep.subr.bf16.mxu0 %v1147_v38 }
  0x57   :  { %1052 = vmatprep.subr.bf16.mxu1 %v1148_v39 }
  0x58   :  { %645 = vmatmul.mubr.bf16.vlgmr.msra.gmra.mrb[0].mxu0 %v905_v34 }
  0x59   :  { %685 = vmatmul.mubr.bf16.vlgmr.msra.gmra.mrb[0].mxu1 %v907_v36  ;;  %1031 = vmatpush3.bf16.msra.mxu0 %v1149_v40 }
  0x5a   :  { %1053 = vmatpush3.bf16.msra.mxu1 %v1150_v41  ;;  %1032 = vmatprep.subr.bf16.mxu0 %v1151_v42 }
  0x5b   :  { %1054 = vmatprep.subr.bf16.mxu1 %v1152_v43  ;;  %724 = vmatprep.mubr.bf16.mxu0 %v910_v8 }
  0x5c   :  { %764 = vmatprep.mubr.bf16.mxu1 %v912_v11 }
  0x5d   :  { %1033 = vmatpush3.bf16.msra.mxu0 %v1153_v44 }
  0x5e   :  { %1055 = vmatpush3.bf16.msra.mxu1 %v1154_v45  ;;  %1034 = vmatprep.subr.bf16.mxu0 %v1155_v46 }
  0x5f   :  { %1056 = vmatprep.subr.bf16.mxu1 %v1156_v47 }
  0x61   :  { %1035 = vmatpush3.bf16.msra.mxu0 %v1157_v48 }
  0x62   :  { %1057 = vmatpush3.bf16.msra.mxu1 %v1158_v49  ;;  %1036 = vmatprep.subr.bf16.mxu0 %v1159_v50  ;;  %v985_v49 = vld [vmem:[%s1387_s4] ss:$0 sm:$0xff] }
  0x63   :  { %1058 = vmatprep.subr.bf16.mxu1 %v1160_v51 }
  0x65   :  { %1037 = vmatpush3.bf16.msra.mxu0 %v1161_v52 }
  0x66   :  { %1059 = vmatpush3.bf16.msra.mxu1 %v1162_v53  ;;  %1038 = vmatprep.subr.bf16.mxu0 %v1163_v54 }
  0x67   :  { %1060 = vmatprep.subr.bf16.mxu1 %v1164_v55 }
  0x69   :  { %1039 = vmatpush3.bf16.msra.mxu0 %v1165_v56 }
  0x6a   :  { %1061 = vmatpush3.bf16.msra.mxu1 %v1166_v57  ;;  %1040 = vmatprep.subr.bf16.mxu0 %v1167_v58 }
  0x6b   :  { %1062 = vmatprep.subr.bf16.mxu1 %v1168_v59 }
  0x6d   :  { %1041 = vmatpush3.bf16.msra.mxu0 %v1169_v60 }
  0x6e   :  { %1063 = vmatpush3.bf16.msra.mxu1 %v1170_v61  ;;  %1042 = vmatprep.subr.bf16.mxu0 %v1171_v62 }
  0x6f   :  { %1064 = vmatprep.subr.bf16.mxu1 %v1172_v63 }
  0x71   :  { %1043 = vmatpush3.bf16.msra.mxu0 %v1173_v0 }
  0x72   :  { %1065 = vmatpush3.bf16.msra.mxu1 %v1174_v1  ;;  %1044 = vmatprep.subr.bf16.mxu0 %v1175_v2 }
  0x73   :  { %1066 = vmatprep.subr.bf16.mxu1 %v1176_v3 }
  0x75   :  { %1045 = vmatpush3.bf16.msra.mxu0 %v1177_v4 }
  0x76   :  { %1067 = vmatpush3.bf16.msra.mxu1 %v1178_v5  ;;  %1083 = vmatprep.subr.bf16.mxu0 %v1290_v13 }
  0x78   :  { %725 = vmatmul.mubr.bf16.vlgmr.msra.gmra.mrb[4].mxu0 %v909_v7 }
  0x79   :  { %765 = vmatmul.mubr.bf16.vlgmr.msra.gmra.mrb[4].mxu1 %v911_v10  ;;  %1084 = vmatpush3.bf16.msra.mxu0 %v1183_v12 }
  0x7a   :  { %1085 = vmatprep.subr.bf16.mxu0 %v1290_v13  ;;  %1099 = vmatprep.mubr.msk.bf16.mxu0 %vm1291_vm0, %v1290_v13 }
  0x7d   :  { %1086 = vmatpush3.bf16.msra.mxu0 %v1184_v14 }
  0x7e   :  { %1087 = vmatprep.subr.bf16.mxu0 %v1290_v13 }
  0x81   :  { %1088 = vmatpush3.bf16.msra.mxu0 %v1185_v15 }
  0x82   :  { %1089 = vmatprep.subr.bf16.mxu0 %v1290_v13 }
  0x85   :  { %1090 = vmatpush3.bf16.msra.mxu0 %v1186_v16 }
  0x86   :  { %1091 = vmatprep.subr.bf16.mxu0 %v1290_v13 }
  0x89   :  { %1092 = vmatpush3.bf16.msra.mxu0 %v1187_v17 }
  0x8a   :  { %1093 = vmatprep.subr.bf16.mxu0 %v1290_v13 }
  0x8d   :  { %1094 = vmatpush3.bf16.msra.mxu0 %v1188_v18 }
  0x8e   :  { %1095 = vmatprep.subr.bf16.mxu0 %v1290_v13 }
  0x91   :  { %1096 = vmatpush3.bf16.msra.mxu0 %v1189_v19 }
  0x92   :  { %1097 = vmatprep.subr.bf16.mxu0 %v1290_v13 }
  0x95   :  { %1098 = vmatpush3.bf16.msra.mxu0 %v1190_v20 }
 0x12b   :  { %v1002_v21 = vpop.f32.mrb[0].mxu0 }
 0x12c   :  { %v1024_v22 = vpop.f32.mrb[0].mxu1  ;;  %v1003_v24 = vpop.f32.mrb[1].mxu0 }
 0x12d   :  { %v1025_v25 = vpop.f32.mrb[1].mxu1  ;;  %v1004_v26 = vadd.f32 %v1003_v24, %v1002_v21  ;;  %v1005_v28 = vpop.f32.mrb[2].mxu0 }
 0x12e   :  { %v1026_v27 = vadd.f32 %v1025_v25, %v1024_v22  ;;  %v1027_v29 = vpop.f32.mrb[2].mxu1  ;;  %v1006_v30 = vpop.f32.mrb[3].mxu0 }
 0x12f   :  { %v1028_v31 = vpop.f32.mrb[3].mxu1  ;;  %v647_v32 = vadd.f32 %v1004_v26, %v904_v23 }
 0x131   :  { %v687_v33 = vadd.f32 %v1026_v27, %v647_v32 }
 0x14b   :  { %v1046_v34 = vpop.f32.mrb[4].mxu0 }
 0x14c   :  { %v1068_v35 = vpop.f32.mrb[4].mxu1  ;;  %v1047_v36 = vpop.f32.mrb[5].mxu0 }
 0x14d   :  { %v1069_v37 = vpop.f32.mrb[5].mxu1  ;;  %v1048_v38 = vadd.f32 %v1047_v36, %v1046_v34  ;;  %v1049_v40 = vpop.f32.mrb[6].mxu0 }
 0x14e   :  { %v1070_v39 = vadd.f32 %v1069_v37, %v1068_v35  ;;  %v1071_v41 = vpop.f32.mrb[6].mxu1  ;;  %v1050_v42 = vpop.f32.mrb[7].mxu0 }
 0x14f   :  { %v1072_v43 = vpop.f32.mrb[7].mxu1  ;;  %v727_v44 = vadd.f32 %v1048_v38, %v687_v33 }
 0x151   :  { %v767_v45 = vadd.f32 %v1070_v39, %v727_v44 }
 0x153   :  { %v772_v46 = vmax.f32 %v767_v45, 0.0 }
 0x155   :  { %v773_v47 = vpack.c.bf16 %v772_v46, %v772_v46 }
 0x157   :  { %1100 = vmatmul.mubr.bf16.vlgmr.msra.gmra.mrb[8].mxu0 %v773_v47 }
 0x22a   :  { %v872_v48 = vpop.f32.mrb[8].mxu0 }
 0x22b   :  { %v878_v50 = vmul.f32 0.33333334, %v872_v48  ;;  %v1101_v51 = vpop.f32.mrb[9].mxu0 }
 0x22c   :  { %v875_v52 = vpop.f32.mrb[10].mxu0 }
 0x22d   :  { %v886_v53 = vadd.f32 %v985_v49, %v878_v50  ;;  %v1102_v54 = vpop.f32.mrb[11].mxu0 }
 0x22f   :  { %887 = vst [vmem:[#allocation8] sm:$0xff] %v886_v53 }
 0x230   :  { %1268 = shalt.err (!%p1265_p0)
}
 0x231   :  { %s1269_s4 = scalar_lea.hbm %s1388_s5, 128 }
 0x232   :  { %p1270_p1 = scmp.ne.s32.totalorder %s1388_s5, %s1269_s4  ;;  %p1273_p2 = scmp.lt.u32.totalorder %s1269_s4, %s1388_s5 }
 0x234   :  { %p1275_p3 = pnand %p1273_p2, %p1270_p1 }
 0x236   :  { %1278 = shalt.err (!%p1275_p3)
}
 0x237   :  { %897 = dma.vmem_to_hbm [thread:$0]  %s895_s7, 128, %s1388_s5, [#allocation4]  }
 0x238   :  { %1283 = dma.done.wait [#allocation4], 128  }
 0x239   :  { %1284 = vsyncadd [#allocation4], 4294967168 }
 0x23a   :  { %901 = vsyncpa [#allocation3], 1 }
 0x23b   :  { %902 = vsyncpa [#allocation6], 1 }
 0x23c   :  { %903 = vsyncpa [#allocation4], 1 }

</bundles_post_ra>
